<compile_context>
chip_gen: v7x
topology: tpu7x:2x2x1
jax: 0.10.0
libtpu: 0.0.40
codegen_flags: <defaults>
</compile_context>

<pallas_src>
import jax
import jax.numpy as jnp
from jax import lax
from jax.experimental import pallas as pl
from jax.experimental.pallas import tpu as pltpu


# --------------------------------------------------------------------------- kernel

def dste_kernel(x_ref, idx_ref, ts_w_ref, ts_b_ref, emb_w_ref, o_ref):
    """One (batch, node-tile) block.

    x_ref     : (C, tile_n)   compute dtype  flattened (t, d) channels, nodes on lanes
    idx_ref   : (2, tile_n)   int32          row 0 = time-in-day idx, row 1 = day-in-week idx
    ts_w_ref  : (E, C)        compute dtype  1x1-conv weight
    ts_b_ref  : (E, 1)        float32        1x1-conv bias
    emb_w_ref : (E, OH_PAD)   compute dtype  [tid_emb.T | diw_emb.T | zero pad]
    o_ref     : (2E, tile_n)  float32        rows [0,E)=time-series, [E,2E)=temporal
    """
    e = ts_w_ref.shape[0]
    oh = emb_w_ref.shape[1]
    tile_n = x_ref.shape[1]

    # ---- time-series half: (E, tile_n) = ts_w @ x + b (bias added in f32) --------
    ts = jnp.dot(ts_w_ref[...], x_ref[...], preferred_element_type=jnp.float32)
    o_ref[:e, :] = ts + ts_b_ref[...]

    # ---- temporal half: embedding gather as one-hot matmul -----------------------
    # one-hot rows live on sublanes, nodes on lanes; tid/diw broadcast along sublanes.
    row = lax.broadcasted_iota(jnp.int32, (oh, tile_n), 0)
    tid = idx_ref[0:1, :]                                  # (1, tile_n)
    diw = idx_ref[1:2, :]                                  # (1, tile_n)
    onehot = ((row == tid) | (row == diw + 288)).astype(emb_w_ref.dtype)
    o_ref[e:, :] = jnp.dot(emb_w_ref[...], onehot, preferred_element_type=jnp.float32)


# --------------------------------------------------------------------------- wrapper

def _round_up(a, m):
    return (a + m - 1) // m * m


def dste_forward(x, params, *, input_dim=3, tile_n_max=1024,
                 compute_dtype=jnp.bfloat16):
    B, T, N, _ = x.shape
    E = params["ts_w"].shape[0]
    C = input_dim * T                      # flattened (time, feature) channels = 36
    OH_PAD = 384                           # 288 + 7 temporal one-hot rows, padded to 3*128

    # ---------------- layout plumbing (XLA, cheap) ----------------
    # (B, T, N, D) -> (B, T, D, N) -> (B, T*D, N): channel order t*D + d, matching the
    # module's transpose(1,2).view(B, N, -1) flattening.  Indices come from f32 x.
    x_cn = jnp.transpose(x[..., :input_dim], (0, 1, 3, 2)).reshape(B, C, N)
    x_cn = x_cn.astype(compute_dtype)
    tid_idx = jnp.clip((x[:, -1, :, 1] * 288.0).astype(jnp.int32), 0, 287)
    diw_idx = jnp.clip(x[:, -1, :, 2].astype(jnp.int32), 0, 6)
    idx = jnp.stack([tid_idx, diw_idx], axis=1)                        # (B, 2, N) int32

    # parameters in kernel-friendly layouts
    ts_w = params["ts_w"].astype(compute_dtype)                        # (E, C)
    ts_b = params["ts_b"].reshape(E, 1).astype(jnp.float32)            # (E, 1)
    emb_w = jnp.zeros((E, OH_PAD), jnp.float32)
    emb_w = emb_w.at[:, :288].set(params["tid_emb"].T)
    emb_w = emb_w.at[:, 288:295].set(params["diw_emb"].T)
    emb_w = emb_w.astype(compute_dtype)                                # (E, OH_PAD)

    # lane-dense node tile (>=128), as large as sensible to amortize pipeline overhead
    tile_n = min(tile_n_max, _round_up(N, 128))
    n_pad = _round_up(N, tile_n)
    if n_pad != N:
        x_cn = jnp.pad(x_cn, ((0, 0), (0, 0), (0, n_pad - N)))
        idx = jnp.pad(idx, ((0, 0), (0, 0), (0, n_pad - N)))

    x_out = pl.pallas_call(
        dste_kernel,
        out_shape=jax.ShapeDtypeStruct((B, 2 * E, n_pad), jnp.float32),
        grid_spec=pltpu.PrefetchScalarGridSpec(
            num_scalar_prefetch=0,
            grid=(B, n_pad // tile_n),
            in_specs=[
                pl.BlockSpec((None, C, tile_n), lambda b, j: (b, 0, j)),
                pl.BlockSpec((None, 2, tile_n), lambda b, j: (b, 0, j)),
                pl.BlockSpec((E, C), lambda b, j: (0, 0)),
                pl.BlockSpec((E, 1), lambda b, j: (0, 0)),
                pl.BlockSpec((E, OH_PAD), lambda b, j: (0, 0)),
            ],
            out_specs=pl.BlockSpec((None, 2 * E, tile_n), lambda b, j: (b, 0, j)),
        ),
        compiler_params=pltpu.CompilerParams(
            dimension_semantics=("parallel", "parallel"),
            vmem_limit_bytes=32 * 1024 * 1024,
        ),
    )(x_cn, idx, ts_w, ts_b, emb_w)

    x_out = x_out[:, :, :N]                       # drop node padding

    # ---------------- adjacency: parameter-only, hoisted to plain XLA --------------
    # S_conv over the batch-replicated gram collapses to sum(s_w) * gram + s_b.
    node = params["node_emb"].astype(jnp.float32)
    gram = jnp.dot(node, node.T, precision=lax.Precision.HIGHEST)
    A = jnp.sum(params["s_w"]) * gram + params["s_b"][0]
    return x_out, A


# --------------------------------------------------------------------------- helpers

def init_params(key, *, edim, num_nodes, batch_size, input_dim=3, input_len=12):
    ks = jax.random.split(key, 7)

    def xavier(k, shape):
        limit = (6.0 / (shape[0] + shape[1])) ** 0.5
        return jax.random.uniform(k, shape, jnp.float32, -limit, limit)

    cin = input_dim * input_len
    return {
        "node_emb": xavier(ks[0], (num_nodes, edim)),            # (N, E)
        "tid_emb": xavier(ks[1], (288, edim)),                   # (288, E)
        "diw_emb": xavier(ks[2], (7, edim)),                     # (7, E)
        "ts_w": jax.random.uniform(ks[3], (edim, cin), jnp.float32, -1, 1) / cin ** 0.5,
        "ts_b": jax.random.uniform(ks[4], (edim,), jnp.float32, -1, 1) / cin ** 0.5,
        "s_w": jax.random.uniform(ks[5], (batch_size,), jnp.float32, -1, 1) / batch_size ** 0.5,
        "s_b": jax.random.uniform(ks[6], (1,), jnp.float32, -1, 1) / batch_size ** 0.5,
    }


def dste_reference(x, params, *, input_dim=3):
    """Pure-JAX f32 reference mirroring the PyTorch forward."""
    B, T, N, _ = x.shape
    tid = params["tid_emb"][(x[:, -1, :, 1] * 288.0).astype(jnp.int32)]   # (B, N, E)
    diw = params["diw_emb"][x[:, -1, :, 2].astype(jnp.int32)]             # (B, N, E)
    inp = jnp.transpose(x[..., :input_dim], (0, 2, 1, 3)).reshape(B, N, T * input_dim)
    ts = jnp.einsum("bnc,ec->ben", inp, params["ts_w"],
                    precision=lax.Precision.HIGHEST) + params["ts_b"][None, :, None]
    tem = jnp.transpose(tid + diw, (0, 2, 1))
    x_out = jnp.concatenate([ts, tem], axis=1)                            # (B, 2E, N)
    node = params["node_emb"]
    gram = jnp.dot(node, node.T, precision=lax.Precision.HIGHEST)
    A = jnp.sum(params["s_w"]) * gram + params["s_b"][0]
    return x_out, A


def dste_reference_bf16(x, params, *, input_dim=3):
    """Reference with the kernel's bf16 operand rounding applied (f32 accumulation);
    indices stay derived from the f32 input, exactly as in dste_forward."""
    B, T, N, _ = x.shape
    rnd = lambda v: v.astype(jnp.bfloat16).astype(jnp.float32)
    tid = rnd(params["tid_emb"])[(x[:, -1, :, 1] * 288.0).astype(jnp.int32)]
    diw = rnd(params["diw_emb"])[x[:, -1, :, 2].astype(jnp.int32)]
    inp = rnd(jnp.transpose(x[..., :input_dim], (0, 2, 1, 3)).reshape(B, N, T * input_dim))
    ts = jnp.einsum("bnc,ec->ben", inp, rnd(params["ts_w"]),
                    precision=lax.Precision.HIGHEST) + params["ts_b"][None, :, None]
    tem = jnp.transpose(tid + diw, (0, 2, 1))
    return jnp.concatenate([ts, tem], axis=1)


if __name__ == "__main__":
    B, T, N, EDIM, INPUT_DIM = 2, 12, 16, 32, 3

    key = jax.random.PRNGKey(0)
    kp, k0, k1, k2 = jax.random.split(key, 4)
    params = init_params(kp, edim=EDIM, num_nodes=N, batch_size=B,
                         input_dim=INPUT_DIM, input_len=T)

    # feature 0: signal; feature 1: time-in-day fraction in [0,1); feature 2: day-in-week {0..6}
    f0 = jax.random.normal(k0, (B, T, N, 1), jnp.float32)
    f1 = jax.random.uniform(k1, (B, T, N, 1), jnp.float32, 0.0, 0.999)
    f2 = jax.random.randint(k2, (B, T, N, 1), 0, 7).astype(jnp.float32)
    x = jnp.concatenate([f0, f1, f2], axis=-1)                            # (B, T, N, 3)

    x_ref, A_ref = dste_reference(x, params, input_dim=INPUT_DIM)

    # fast path (default): bf16 MXU operands, f32 accumulation.
    x_bf16, A = dste_forward(x, params, input_dim=INPUT_DIM,
                             compute_dtype=jnp.bfloat16)
    jax.block_until_ready((x_bf16, A))
    assert x_bf16.shape == (B, 2 * EDIM, N) and A.shape == (N, N)
    x_ref_bf16 = dste_reference_bf16(x, params, input_dim=INPUT_DIM)
    assert jnp.allclose(x_bf16, x_ref_bf16, atol=2e-3, rtol=2e-3)
    assert jnp.allclose(A, A_ref, atol=1e-4, rtol=1e-4)

    # exact path: f32 MXU operands, matches the f32 reference tightly.
    x_f32, _ = dste_forward(x, params, input_dim=INPUT_DIM,
                            compute_dtype=jnp.float32)
    jax.block_until_ready(x_f32)
    assert jnp.allclose(x_f32, x_ref, atol=1e-4, rtol=1e-4)

    print("KERNEL_OK")
</pallas_src>

<mosaic_0001>
module attributes {stable_mosaic.version = 11 : i64} {
  func.func @dste_kernel(%arg0: i32, %arg1: i32, %arg2: memref<1x36x128xbf16, #tpu.memory_space<vmem>>, %arg3: memref<1x2x128xi32, #tpu.memory_space<vmem>>, %arg4: memref<32x36xbf16, #tpu.memory_space<vmem>>, %arg5: memref<32x1xf32, #tpu.memory_space<vmem>>, %arg6: memref<32x384xbf16, #tpu.memory_space<vmem>>, %arg7: memref<1x64x128xf32, #tpu.memory_space<vmem>>) attributes {dimension_semantics = [#tpu.dimension_semantics<parallel>, #tpu.dimension_semantics<parallel>], iteration_bounds = array<i64: 2, 1>, scalar_prefetch = 0 : i64, scratch_operands = 0 : i64, tpu.core_type = #tpu.core_type<tc>, window_params = [{transform_indices = @transform_0, window_bounds = array<i64: 1, 36, 128>}, {transform_indices = @transform_1, window_bounds = array<i64: 1, 2, 128>}, {pipeline_mode = #tpu.pipeline_mode<synchronous>, transform_indices = @transform_2, window_bounds = array<i64: 32, 36>}, {pipeline_mode = #tpu.pipeline_mode<synchronous>, transform_indices = @transform_3, window_bounds = array<i64: 32, 1>}, {pipeline_mode = #tpu.pipeline_mode<synchronous>, transform_indices = @transform_4, window_bounds = array<i64: 32, 384>}, {transform_indices = @transform_5, window_bounds = array<i64: 1, 64, 128>}]} {
    %c0 = arith.constant 0 : index
    %c0_0 = arith.constant 0 : index
    %0 = vector.load %arg4[%c0, %c0_0] : memref<32x36xbf16, #tpu.memory_space<vmem>>, vector<32x36xbf16>
    %c0_1 = arith.constant 0 : index
    %c0_2 = arith.constant 0 : index
    %c0_3 = arith.constant 0 : index
    %1 = vector.load %arg2[%c0_1, %c0_2, %c0_3] : memref<1x36x128xbf16, #tpu.memory_space<vmem>>, vector<1x36x128xbf16>
    %2 = vector.shape_cast %1 : vector<1x36x128xbf16> to vector<36x128xbf16>
    %cst = arith.constant dense<0.000000e+00> : vector<32x128xf32>
    %3 = tpu.matmul %0, %2, %cst {dimension_numbers = #tpu.dot_dimension_numbers<[1], [0], [0], [1], [0, 0, 1, 1], [], []>} : vector<32x36xbf16>, vector<36x128xbf16>, vector<32x128xf32> -> vector<32x128xf32>
    %c0_4 = arith.constant 0 : index
    %c0_5 = arith.constant 0 : index
    %4 = vector.load %arg5[%c0_4, %c0_5] : memref<32x1xf32, #tpu.memory_space<vmem>>, vector<32x1xf32>
    %5 = vector.broadcast %4 : vector<32x1xf32> to vector<32x128xf32>
    %6 = arith.addf %3, %5 : vector<32x128xf32>
    %c0_6 = arith.constant 0 : index
    %c0_7 = arith.constant 0 : index
    %c0_8 = arith.constant 0 : index
    %7 = vector.load %arg7[%c0_6, %c0_7, %c0_8] : memref<1x64x128xf32, #tpu.memory_space<vmem>>, vector<1x32x128xf32>
    %8 = vector.shape_cast %7 : vector<1x32x128xf32> to vector<32x128xf32>
    %9 = vector.shape_cast %6 : vector<32x128xf32> to vector<1x32x128xf32>
    tpu.vector_store %arg7[%c0_6, %c0_7, %c0_8], %9 {strides = array<i32>} : memref<1x64x128xf32, #tpu.memory_space<vmem>>, vector<1x32x128xf32>,
    %10 = tpu.iota {dimensions = array<i32: 0>} : vector<384x128xi32>
    %c0_9 = arith.constant 0 : index
    %c0_10 = arith.constant 0 : index
    %c0_11 = arith.constant 0 : index
    %11 = vector.load %arg3[%c0_9, %c0_10, %c0_11] : memref<1x2x128xi32, #tpu.memory_space<vmem>>, vector<1x1x128xi32>
    %12 = vector.shape_cast %11 : vector<1x1x128xi32> to vector<1x128xi32>
    %c0_12 = arith.constant 0 : index
    %c1 = arith.constant 1 : index
    %c0_13 = arith.constant 0 : index
    %13 = vector.load %arg3[%c0_12, %c1, %c0_13] : memref<1x2x128xi32, #tpu.memory_space<vmem>>, vector<1x1x128xi32>
    %14 = vector.shape_cast %13 : vector<1x1x128xi32> to vector<1x128xi32>
    %15 = vector.broadcast %12 : vector<1x128xi32> to vector<384x128xi32>
    %16 = arith.cmpi eq, %10, %15 : vector<384x128xi32>
    %c288_i32 = arith.constant 288 : i32
    %17 = vector.broadcast %c288_i32 : i32 to vector<1x128xi32>
    %18 = arith.addi %14, %17 : vector<1x128xi32>
    %19 = vector.broadcast %18 : vector<1x128xi32> to vector<384x128xi32>
    %20 = arith.cmpi eq, %10, %19 : vector<384x128xi32>
    %21 = arith.ori %16, %20 : vector<384x128xi1>
    %22 = arith.extui %21 : vector<384x128xi1> to vector<384x128xi32>
    %23 = arith.sitofp %22 : vector<384x128xi32> to vector<384x128xf32>
    %24 = arith.truncf %23 : vector<384x128xf32> to vector<384x128xbf16>
    %c0_14 = arith.constant 0 : index
    %c0_15 = arith.constant 0 : index
    %25 = vector.load %arg6[%c0_14, %c0_15] : memref<32x384xbf16, #tpu.memory_space<vmem>>, vector<32x384xbf16>
    %cst_16 = arith.constant dense<0.000000e+00> : vector<32x128xf32>
    %26 = tpu.matmul %25, %24, %cst_16 {dimension_numbers = #tpu.dot_dimension_numbers<[1], [0], [0], [1], [0, 0, 1, 1], [], []>} : vector<32x384xbf16>, vector<384x128xbf16>, vector<32x128xf32> -> vector<32x128xf32>
    %c0_17 = arith.constant 0 : index
    %c32 = arith.constant 32 : index
    %c0_18 = arith.constant 0 : index
    %27 = vector.load %arg7[%c0_17, %c32, %c0_18] : memref<1x64x128xf32, #tpu.memory_space<vmem>>, vector<1x32x128xf32>
    %28 = vector.shape_cast %27 : vector<1x32x128xf32> to vector<32x128xf32>
    %29 = vector.shape_cast %26 : vector<32x128xf32> to vector<1x32x128xf32>
    tpu.vector_store %arg7[%c0_17, %c32, %c0_18], %29 {strides = array<i32>} : memref<1x64x128xf32, #tpu.memory_space<vmem>>, vector<1x32x128xf32>,
    return
  }
  func.func @transform_0(%arg0: i32, %arg1: i32) -> (i32, i32, i32) {
    %c0_i32 = arith.constant 0 : i32
    %c0_i32_0 = arith.constant 0 : i32
    return %arg0, %c0_i32, %arg1 : i32, i32, i32
  }
  func.func @transform_1(%arg0: i32, %arg1: i32) -> (i32, i32, i32) {
    %c0_i32 = arith.constant 0 : i32
    %c0_i32_0 = arith.constant 0 : i32
    return %arg0, %c0_i32, %arg1 : i32, i32, i32
  }
  func.func @transform_2(%arg0: i32, %arg1: i32) -> (i32, i32) {
    %c0_i32 = arith.constant 0 : i32
    %c0_i32_0 = arith.constant 0 : i32
    %c0_i32_1 = arith.constant 0 : i32
    return %c0_i32, %c0_i32_0 : i32, i32
  }
  func.func @transform_3(%arg0: i32, %arg1: i32) -> (i32, i32) {
    %c0_i32 = arith.constant 0 : i32
    %c0_i32_0 = arith.constant 0 : i32
    %c0_i32_1 = arith.constant 0 : i32
    return %c0_i32, %c0_i32_0 : i32, i32
  }
  func.func @transform_4(%arg0: i32, %arg1: i32) -> (i32, i32) {
    %c0_i32 = arith.constant 0 : i32
    %c0_i32_0 = arith.constant 0 : i32
    %c0_i32_1 = arith.constant 0 : i32
    return %c0_i32, %c0_i32_0 : i32, i32
  }
  func.func @transform_5(%arg0: i32, %arg1: i32) -> (i32, i32, i32) {
    %c0_i32 = arith.constant 0 : i32
    %c0_i32_0 = arith.constant 0 : i32
    return %arg0, %c0_i32, %arg1 : i32, i32, i32
  }
}

</mosaic_0001>

<bundles_post_ra>
// kernel: tpu_custom_call.1
= control target key start
LH: loop header
LB: loop body
LE: loop exit
PB: predicated region body
PF: predicated region fallthrough
CT: control target
= control target key end

     0   :  { %10 = vsyncpa [#allocation3], 0  ;;  %s1832_s0 = inlined_call_operand.vmem [shape: bf16[2,36,128], index: 0, kind: input, shape index: {}]   ;;  %s1833_s1 = inlined_call_operand.vmem [shape: s32[2,2,128], index: 1, kind: input, shape index: {}]   ;;  %s1834_s2 = inlined_call_operand.vmem [shape: bf16[32,36], index: 2, kind: input, shape index: {}]   ;;  %s1835_s3 = inlined_call_operand.vmem [shape: f32[32,1], index: 3, kind: input, shape index: {}]   ;;  %s1836_s4 = inlined_call_operand.vmem [shape: bf16[32,384], index: 4, kind: input, shape index: {}]   ;;  %s1837_s5 = inlined_call_operand.hbm [shape: f32[2,64,128], index: 5, kind: output, shape index: {}]  }
   0x1   :  { %12 = vsyncpa [#allocation3 + $0x1], 0  ;;  %s1361_s18 = smov 0   ;;  %s1363_s19 = smov 0  }
   0x2   :  { %s1365_s20 = smov 0   ;;  %s1367_s21 = smov 0  }
   0x3   :  { %s1369_s22 = smov 0   ;;  %s1371_s23 = smov 0  }
   0x4 LB: > { %s973_s24 = sadd.s32 4294967295, %s1324_s23   ;;  %s974_s25 = sadd.s32 4294967294, %s1324_s23   ;;  %s1324_s23 = sphi %s1371_s23, %s18_s23   ;;  %s1320_s22 = sphi %s1369_s22, %s1868_s22   ;;  %s1316_s21 = sphi %s1367_s21, %s1867_s21   ;;  %s1312_s20 = sphi %s1365_s20, %s1866_s20   ;;  %s1308_s19 = sphi %s1363_s19, %s1865_s19   ;;  %s1304_s18 = sphi %s1361_s18, %s1864_s18  }
   0x5   : > { %s30_s26 = sadd.s32 1, %s1320_s22  ;;  %s158_s27 = sadd.s32 1, %s1312_s20 }
   0x6   : > { %p32_p0 = scmp.ge.s32.totalorder %s30_s26, 2  ;;  %p168_p1 = scmp.ne.s32.totalorder %s1312_s20, %s1308_s19 }
   0x7   : > { %p169_p2 = scmp.eq.s32.totalorder %s973_s24, 1  ;;  %p174_p3 = scmp.ne.s32.totalorder %s1308_s19, %s1304_s18 }
   0x8   : > { %s1870_s26 = smov (%p32_p0, %s30_s26), 0  ;;  %p175_p5 = scmp.eq.s32.totalorder %s974_s25, 1 }
   0x9   : > { %p1401_p4 = por %p169_p2, %p168_p1  ;;  %s153_s29 = ssub.s32 %s1320_s22, %s1870_s26 }
   0xa   : > { %p977_p6 = scmp.ge.s32.totalorder %s1324_s23, 1  ;;  %p156_p7 = scmp.eq.s32.totalorder %s153_s29, 0 }
   0xb   : > { %p1408_p8 = por %p175_p5, %p174_p3  ;;  %p223_p9 = scmp.lt.s32.totalorder %s1324_s23, 3 }
   0xc   : > { %s1414_s6 = scalar_select %p156_p7, %s1312_s20, %s158_s27  }
   0xd   : > { %p224_p10 = pnand %p977_p6, %p223_p9 }
   0xe   : > { %p261_p11 = scmp.lt.s32.totalorder (!%p224_p10), %s1316_s21, 1  ;;  %v399_v0 = vlaneseq (!%p224_p10)  ;;  %v1236_v1 = vld [vmem:[%s1834_s2] sm:$0xff] (!%p224_p10)   ;;  %vm335_vm0 = vcmask (!%p224_p10), 293888   ;;  %v1326_v4 = vmov (!%p224_p10), 0   ;;  %v288_v15 = vld [vmem:[%s1835_s3 + $0x10] sm:$0xff] (!%p224_p10)  ;;  %vm342_vm8 = vcmask (!%p224_p10), 1041408  }
   0xf   : > { %227 = sbr.rel (%p224_p10) target bundleno = 343 (0x157), region = 40  ;;  %1146 = vmatprep.mubr.msk.bf16.mxu0 (!%p224_p10), %vm335_vm0, %v1236_v1  ;;  %v1240_v3 = vld [vmem:[%s1836_s4 + $0x4] ss:$12 sps:$4 sm:$0xff] (!%p224_p10)   ;;  %1232 = vset.pattern.permute.xlu1 (!%p224_p10), %v1326_v4  ;;  %v289_v21 = vld [vmem:[%s1835_s3 + $0x18] sm:$0xff] (!%p224_p10)  ;;  %v1327_v22 = vmov (!%p224_p10), 1.0|1.0  }
  0x10   : > { %v1421_v2 = vshrl.u32 (!%p224_p10), %v399_v0, 7  ;;  %1231 = vset.pattern.permute.xlu0 (!%p224_p10), %v1326_v4  ;;  %795 = vmatprep.mubr.bf16.mxu1 (!%p224_p10), %v1240_v3  ;;  %v286_v20 = vld [vmem:[%s1835_s3] sm:$0xff] (!%p224_p10)  ;;  %v1237_v26 = vld [vmem:[%s1834_s2 + $0x8] sm:$0xff] (!%p224_p10)   ;;  %s258_s10 = sand.u32 (!%p224_p10), 1, %s1308_s19  }
  0x11   : > { %302 = vperm.xlu1 (!%p224_p10), %1232, %v288_v15   ;;  %292 = vperm.xlu0 (!%p224_p10), %1231, %v286_v20   ;;  %v287_v28 = vld [vmem:[%s1835_s3 + $0x8] sm:$0xff] (!%p224_p10)  ;;  %v1244_v15 = vld [vmem:[%s1836_s4 + $0x18] ss:$12 sps:$4 sm:$0xff] (!%p224_p10)   ;;  %s978_s11 = sshll.u32 (!%p224_p10), %s258_s10, 6 }
  0x12   : > { %v505_v5 = vsub.s32 (!%p224_p10), 0, %v1421_v2  ;;  %v416_v6 = vadd.s32 (!%p224_p10), 128, %v1421_v2  ;;  %v417_v9 = vadd.s32 (!%p224_p10), 136, %v1421_v2  ;;  %v401_v14 = vadd.s32 (!%p224_p10), 8, %v1421_v2  ;;  %v1243_v30 = vld [vmem:[%s1836_s4 + $0x8] ss:$12 sps:$4 sm:$0xff] (!%p224_p10)  }
  0x13   : > { %v418_v17 = vadd.s32 (!%p224_p10), 144, %v1421_v2  ;;  %v419_v18 = vadd.s32 (!%p224_p10), 152, %v1421_v2  ;;  %v402_v19 = vadd.s32 (!%p224_p10), 16, %v1421_v2  ;;  %v403_v25 = vadd.s32 (!%p224_p10), 24, %v1421_v2 }
  0x14   : > { %v420_v27 = vadd.s32 (!%p224_p10), 160, %v1421_v2  ;;  %v421_v29 = vadd.s32 (!%p224_p10), 168, %v1421_v2  ;;  %v432_v31 = vadd.s32 (!%p224_p10), 256, %v1421_v2  ;;  %v433_v32 = vadd.s32 (!%p224_p10), 264, %v1421_v2 }
  0x15   : > { %307 = vperm.xlu1 (!%p224_p10), %1232, %v289_v21   ;;  %297 = vperm.xlu0 (!%p224_p10), %1231, %v287_v28   ;;  %v404_v33 = vadd.s32 (!%p224_p10), 32, %v1421_v2  ;;  %v405_v34 = vadd.s32 (!%p224_p10), 40, %v1421_v2  ;;  %v422_v35 = vadd.s32 (!%p224_p10), 176, %v1421_v2  ;;  %v423_v37 = vadd.s32 (!%p224_p10), 184, %v1421_v2 }
  0x16   : > { %s262_s9 = scalar_select %p261_p11, %s1316_s21, 1  ;;  %v434_v38 = vadd.s32 272, %v1421_v2  ;;  %v435_v39 = vadd.s32 280, %v1421_v2  ;;  %v406_v40 = vadd.s32 48, %v1421_v2  ;;  %v407_v41 = vadd.s32 56, %v1421_v2 }
  0x17   : > { %v424_v42 = vadd.s32 192, %v1421_v2  ;;  %v425_v43 = vadd.s32 200, %v1421_v2  ;;  %v1553_v45 = vadd.s32 112, %v1421_v2  ;;  %v1556_v46 = vadd.s32 120, %v1421_v2 }
  0x18   : > { %s1171_s12 = smul.u32 20, %s262_s9  ;;  %s980_s13 = sshll.u32 %s262_s9, 1  ;;  %v1559_v47 = vadd.s32 352, %v1421_v2  ;;  %v1568_v49 = vadd.s32 360, %v1421_v2  ;;  %v1571_v50 = vadd.s32 368, %v1421_v2  ;;  %v436_v51 = vadd.s32 288, %v1421_v2 }
  0x19   : > { %s275_s16 = scalar_lea.vmem %s1833_s1, %s980_s13  ;;  %v437_v52 = vadd.s32 296, %v1421_v2  ;;  %v1603_v53 = vadd.s32 376, %v1421_v2  ;;  %v408_v54 = vadd.s32 64, %v1421_v2  ;;  %v409_v55 = vadd.s32 72, %v1421_v2  ;;  %s1096_s13 = sshll.u32 %s1316_s21, 10 }
  0x1a   : > { %s268_s25 = scalar_lea.vmem %s1832_s0, %s1171_s12  ;;  %v1435_v7 = vld [vmem:[%s275_s16] ss:$0 sm:$0xff]  ;;  %v449_v8 = vld [vmem:[%s275_s16 + $0x1] sm:$0x1]  ;;  %v426_v56 = vadd.s32 208, %v1421_v2  ;;  %v427_v58 = vadd.s32 216, %v1421_v2  ;;  %s1777_s17 = scalar_lea.hbm %s1837_s5, %s1096_s13 }
  0x1b   : > { %v1233_v10 = vld [vmem:[%s268_s25] sm:$0xff]   ;;  %v502_v11 = vadd.s32 288, %v449_v8  ;;  %v1234_v12 = vld [vmem:[%s268_s25 + $0x8] sm:$0xff]   ;;  %vm470_vm1 = vcmp.eq.s32.totalorder %v416_v6, %v1435_v7  ;;  %vm471_vm2 = vcmp.eq.s32.totalorder %v417_v9, %v1435_v7  ;;  %v1235_v16 = vld [vmem:[%s268_s25 + $0x10] ss:$0 sps:$4 sm:$0x33]   ;;  %vm454_vm6 = vcmp.eq.s32.totalorder %v1421_v2, %v1435_v7 }
  0x1c   : > { %1140 = vmatprep.subr.bf16.mxu0 %v1233_v10  ;;  %vm455_vm10 = vcmp.eq.s32.totalorder %v401_v14, %v1435_v7  ;;  %vm472_vm14 = vcmp.eq.s32.totalorder %v418_v17, %v1435_v7  ;;  %v344_v24 = vsel %vm342_vm8, %v1235_v16, 0  ;;  %v438_v59 = vadd.s32 304, %v1421_v2  ;;  %s1765_s12 = scalar_lea.vmem [#allocation2], %s978_s11  ;;  %s1786_s21 = scalar_lea.sflag [#allocation3], %s258_s10 }
  0x1d   : > { %v1438_v13 = vrot.slane %v502_v11, %v505_v5  ;;  %1141 = vmatpush3.bf16.msra.mxu0 %v1233_v10  ;;  %v439_v60 = vadd.s32 312, %v1421_v2  ;;  %v410_v61 = vadd.s32 80, %v1421_v2  ;;  %v411_v62 = vadd.s32 88, %v1421_v2  ;;  %s880_s14 = sshll.u32 %s1765_s12, 4  ;;  %s1328_s25 = smov [#allocation2]   ;;  %s1779_s14 = int_to_ptr.vmem [resolvable:$true] %s880_s14 }
  0x1e   : > { %1142 = vmatprep.subr.bf16.mxu0 %v1234_v12  ;;  %v428_v63 = vadd.s32 224, %v1421_v2  ;;  %v429_v1 = vadd.s32 232, %v1421_v2  ;;  %v440_v3 = vadd.s32 320, %v1421_v2  ;;  %v441_v4 = vadd.s32 328, %v1421_v2  ;;  %s1246_s24 = scalar_lea.vmem %s1779_s14, 1024  ;;  %s1250_s27 = sshll.u32 %s1328_s25, 4  ;;  %s1251_s27 = int_to_ptr.vmem [resolvable:$false] %s1250_s27 }
  0x1f   : > { %vm523_vm3 = vcmp.eq.s32.totalorder %v416_v6, %v1438_v13  ;;  %vm524_vm4 = vcmp.eq.s32.totalorder %v417_v9, %v1438_v13  ;;  %vm507_vm7 = vcmp.eq.s32.totalorder %v1421_v2, %v1438_v13  ;;  %vm508_vm11 = vcmp.eq.s32.totalorder %v401_v14, %v1438_v13  ;;  %v1241_v14 = vld [vmem:[%s1836_s4 + $0x1c] ss:$12 sps:$4 sm:$0xff]   ;;  %p1247_p12 = scmp.ne.s32.totalorder %s1779_s14, %s1246_s24  ;;  %s1252_s29 = scalar_lea.vmem %s1251_s27, 2048 }
  0x20   : > { %vm571_vm5 = vmor %vm470_vm1, %vm523_vm3  ;;  %vm525_vm15 = vcmp.eq.s32.totalorder %v418_v17, %v1438_v13  ;;  %vm526_vm3 = vcmp.eq.s32.totalorder %v419_v18, %v1438_v13  ;;  %v412_v5 = vadd.s32 96, %v1421_v2  ;;  %v413_v6 = vadd.s32 104, %v1421_v2  ;;  %p1253_p1 = scmp.lt.s32.totalorder %s1779_s14, %s1251_s27  ;;  %p1254_p2 = scmp.lt.s32.totalorder %s1252_s29, %s1246_s24 }
  0x21   : > { %vm572_vm9 = vmor %vm471_vm2, %vm524_vm4  ;;  %1143 = vmatpush3.bf16.msra.mxu0 %v1234_v12  ;;  %vm473_vm2 = vcmp.eq.s32.totalorder %v419_v18, %v1435_v7  ;;  %v430_v8 = vadd.s32 240, %v1421_v2  ;;  %v431_v10 = vadd.s32 248, %v1421_v2  ;;  %v442_v11 = vadd.s32 336, %v1421_v2  ;;  %p1248_p13 = pnand %p1247_p12, %p1401_p4 }
  0x22   : > { %vm1059_vm12 = vmpackc.low %vm572_vm9, %vm571_vm5  ;;  %1170 = vmatprep.subr.msk.bf16.mxu0 %vm342_vm8, %v1235_v16  ;;  %vm457_vm9 = vcmp.eq.s32.totalorder %v403_v25, %v1435_v7  ;;  %v443_v12 = vadd.s32 344, %v1421_v2  ;;  %v1238_v2 = vld [vmem:[%s1836_s4] ss:$12 sps:$4 sm:$0xff]   ;;  %p1255_p3 = por %p1254_p2, %p1253_p1 }
  0x23   : > { %1102 = vmatprep.subr.msk.bf16.mxu1 %vm1059_vm12, %v1327_v22  ;;  %vm1464_vm13 = vmor %vm454_vm6, %vm507_vm7  ;;  %vm456_vm6 = vcmp.eq.s32.totalorder %v402_v19, %v1435_v7  ;;  %vm509_vm7 = vcmp.eq.s32.totalorder %v402_v19, %v1438_v13  ;;  %v1245_v16 = vld [vmem:[%s1836_s4 + $0x20] ss:$12 sps:$4 sm:$0xff]   ;;  %p1249_p0 = pneg %p1248_p13 }
  0x24   : > { %vm556_vm1 = vmor %vm455_vm10, %vm508_vm11  ;;  %vm510_vm10 = vcmp.eq.s32.totalorder %v403_v25, %v1438_v13 }
  0x25   : > { %vm1043_vm4 = vmpackc.low %vm556_vm1, %vm1464_vm13  ;;  %1145 = vmatpush3.bf16.msra.mxu0 %v344_v24  ;;  %vm474_vm13 = vcmp.eq.s32.totalorder %v420_v27, %v1435_v7  ;;  %vm475_vm1 = vcmp.eq.s32.totalorder %v421_v29, %v1435_v7  ;;  %p1256_p5 = pnand %p1255_p3, %p1249_p0 }
  0x26   : > { %1103 = vmatpush3.bf16.msk.msra.mxu1 %vm1043_vm4, %v1327_v22  ;;  %vm573_vm5 = vmor %vm472_vm14, %vm525_vm15  ;;  %vm527_vm14 = vcmp.eq.s32.totalorder %v420_v27, %v1438_v13 }
  0x27   : > { %vm574_vm8 = vmor %vm473_vm2, %vm526_vm3  ;;  %vm528_vm2 = vcmp.eq.s32.totalorder %v421_v29, %v1438_v13 }
  0x28   : > { %vm1061_vm11 = vmpackc.low %vm574_vm8, %vm573_vm5  ;;  %1147 = vmatmul.mubr.msk.bf16.vlgmr.msra.gmra.mrb[0].mxu0 %vm335_vm0, %v1237_v26  ;;  %vm486_vm0 = vcmp.eq.s32.totalorder %v432_v31, %v1435_v7  ;;  %vm539_vm5 = vcmp.eq.s32.totalorder %v432_v31, %v1438_v13  ;;  %vm540_vm8 = vcmp.eq.s32.totalorder %v433_v32, %v1438_v13 }
  0x29   : > { %1104 = vmatprep.subr.msk.bf16.mxu1 %vm1061_vm11, %v1327_v22  ;;  %vm557_vm12 = vmor %vm456_vm6, %vm509_vm7  ;;  %1166 = vmatprep.mubr.bf16.mxu0 %v1243_v30  ;;  %vm487_vm7 = vcmp.eq.s32.totalorder %v433_v32, %v1435_v7  ;;  %vm458_vm11 = vcmp.eq.s32.totalorder %v404_v33, %v1435_v7 }
  0x2a   : > { %vm558_vm15 = vmor %vm457_vm9, %vm510_vm10 }
  0x2b   : > { %vm1045_vm3 = vmpackc.low %vm558_vm15, %vm557_vm12  ;;  %vm511_vm12 = vcmp.eq.s32.totalorder %v404_v33, %v1438_v13  ;;  %vm512_vm15 = vcmp.eq.s32.totalorder %v405_v34, %v1438_v13 }
  0x2c   : > { %1105 = vmatpush3.bf16.msk.msra.mxu1 %vm1045_vm3, %v1327_v22  ;;  %vm575_vm4 = vmor %vm474_vm13, %vm527_vm14  ;;  %vm459_vm14 = vcmp.eq.s32.totalorder %v405_v34, %v1435_v7  ;;  %vm476_vm3 = vcmp.eq.s32.totalorder %v422_v35, %v1435_v7 }
  0x2d   : > { %vm576_vm6 = vmor %vm475_vm1, %vm528_vm2 }
  0x2e   : > { %vm1063_vm9 = vmpackc.low %vm576_vm6, %vm575_vm4  ;;  %vm529_vm4 = vcmp.eq.s32.totalorder %v422_v35, %v1438_v13  ;;  %vm530_vm6 = vcmp.eq.s32.totalorder %v423_v37, %v1438_v13 }
  0x2f   : > { %1106 = vmatprep.subr.msk.bf16.mxu1 %vm1063_vm9, %v1327_v22  ;;  %vm1514_vm10 = vmor %vm486_vm0, %vm539_vm5  ;;  %vm477_vm5 = vcmp.eq.s32.totalorder %v423_v37, %v1435_v7  ;;  %vm488_vm9 = vcmp.eq.s32.totalorder %v434_v38, %v1435_v7 }
  0x30   : > { %vm588_vm13 = vmor %vm487_vm7, %vm540_vm8 }
  0x31   : > { %vm1075_vm1 = vmpackc.low %vm588_vm13, %vm1514_vm10  ;;  %vm541_vm10 = vcmp.eq.s32.totalorder %v434_v38, %v1438_v13  ;;  %vm542_vm13 = vcmp.eq.s32.totalorder %v435_v39, %v1438_v13 }
  0x32   : > { %1150 = vmatprep.subr.msk.bf16.mxu0 %vm1075_vm1, %v1327_v22  ;;  %vm559_vm2 = vmor %vm458_vm11, %vm511_vm12  ;;  %vm489_vm12 = vcmp.eq.s32.totalorder %v435_v39, %v1435_v7 }
  0x33   : > { %vm560_vm0 = vmor %vm459_vm14, %vm512_vm15  ;;  %1151 = vmatpush3.bf16.msk.msra.mxu0 %vm1075_vm1, %v1327_v22  ;;  %vm460_vm15 = vcmp.eq.s32.totalorder %v406_v40, %v1435_v7  ;;  %vm461_vm1 = vcmp.eq.s32.totalorder %v407_v41, %v1435_v7 }
  0x34   : > { %vm1047_vm7 = vmpackc.low %vm560_vm0, %vm559_vm2  ;;  %vm513_vm2 = vcmp.eq.s32.totalorder %v406_v40, %v1438_v13  ;;  %vm478_vm0 = vcmp.eq.s32.totalorder %v424_v42, %v1435_v7 }
  0x35   : > { %1107 = vmatpush3.bf16.msk.msra.mxu1 %vm1047_vm7, %v1327_v22  ;;  %vm577_vm8 = vmor %vm476_vm3, %vm529_vm4  ;;  %vm514_vm3 = vcmp.eq.s32.totalorder %v407_v41, %v1438_v13  ;;  %vm531_vm7 = vcmp.eq.s32.totalorder %v424_v42, %v1438_v13 }
  0x36   : > { %vm578_vm11 = vmor %vm477_vm5, %vm530_vm6  ;;  %vm479_vm6 = vcmp.eq.s32.totalorder %v425_v43, %v1435_v7 }
  0x37   : > { %vm1065_vm14 = vmpackc.low %vm578_vm11, %vm577_vm8 }
  0x38   : > { %1108 = vmatprep.subr.msk.bf16.mxu1 %vm1065_vm14, %v1327_v22  ;;  %vm1547_vm4 = vmor %vm488_vm9, %vm541_vm10  ;;  %vm497_vm10 = vcmp.eq.s32.totalorder %v443_v12, %v1435_v7  ;;  %vm550_vm9 = vcmp.eq.s32.totalorder %v443_v12, %v1438_v13 }
  0x39   : > { %vm1561_vm5 = vmor %vm489_vm12, %vm542_vm13  ;;  %vm544_vm13 = vcmp.eq.s32.totalorder %v437_v52, %v1438_v13 }
  0x3a   : > { %vm1077_vm8 = vmpackc.low %vm1561_vm5, %vm1547_vm4 }
  0x3b   : > { %1152 = vmatprep.subr.msk.bf16.mxu0 %vm1077_vm8, %v1327_v22  ;;  %vm561_vm11 = vmor %vm460_vm15, %vm513_vm2  ;;  %vm532_vm15 = vcmp.eq.s32.totalorder %v425_v43, %v1438_v13  ;;  %vm515_vm2 = vcmp.eq.s32.totalorder %v408_v54, %v1438_v13 }
  0x3c   : > { %vm562_vm5 = vmor %vm461_vm1, %vm514_vm3  ;;  %1153 = vmatpush3.bf16.msk.msra.mxu0 %vm1077_vm8, %v1327_v22  ;;  %vm490_vm3 = vcmp.eq.s32.totalorder %v436_v51, %v1435_v7  ;;  %vm543_vm8 = vcmp.eq.s32.totalorder %v436_v51, %v1438_v13 }
  0x3d   : > { %vm1049_vm12 = vmpackc.low %vm562_vm5, %vm561_vm11  ;;  %vm516_vm11 = vcmp.eq.s32.totalorder %v409_v55, %v1438_v13 }
  0x3e   : > { %1109 = vmatpush3.bf16.msk.msra.mxu1 %vm1049_vm12, %v1327_v22  ;;  %vm579_vm1 = vmor %vm478_vm0, %vm531_vm7  ;;  %vm491_vm12 = vcmp.eq.s32.totalorder %v437_v52, %v1435_v7  ;;  %vm462_vm7 = vcmp.eq.s32.totalorder %v408_v54, %v1435_v7 }
  0x3f   : > { %vm580_vm5 = vmor %vm479_vm6, %vm532_vm15  ;;  %vm463_vm15 = vcmp.eq.s32.totalorder %v409_v55, %v1435_v7 }
  0x40   : > { %vm1067_vm4 = vmpackc.low %vm580_vm5, %vm579_vm1 }
  0x41   : > { %1110 = vmatprep.subr.msk.bf16.mxu1 %vm1067_vm4, %v1327_v22  ;;  %vm1628_vm0 = vmor %vm490_vm3, %vm543_vm8  ;;  %vm480_vm3 = vcmp.eq.s32.totalorder %v426_v56, %v1435_v7  ;;  %vm533_vm8 = vcmp.eq.s32.totalorder %v426_v56, %v1438_v13 }
  0x42   : > { %vm592_vm6 = vmor %vm491_vm12, %vm544_vm13  ;;  %vm481_vm13 = vcmp.eq.s32.totalorder %v427_v58, %v1435_v7  ;;  %vm534_vm12 = vcmp.eq.s32.totalorder %v427_v58, %v1438_v13 }
  0x43   : > { %vm1079_vm1 = vmpackc.low %vm592_vm6, %vm1628_vm0 }
  0x44   : > { %1154 = vmatprep.subr.msk.bf16.mxu0 %vm1079_vm1, %v1327_v22  ;;  %vm563_vm4 = vmor %vm462_vm7, %vm515_vm2  ;;  %vm492_vm2 = vcmp.eq.s32.totalorder %v438_v59, %v1435_v7  ;;  %vm545_vm7 = vcmp.eq.s32.totalorder %v438_v59, %v1438_v13 }
  0x45   : > { %vm564_vm5 = vmor %vm463_vm15, %vm516_vm11  ;;  %1155 = vmatpush3.bf16.msk.msra.mxu0 %vm1079_vm1, %v1327_v22  ;;  %vm493_vm11 = vcmp.eq.s32.totalorder %v439_v60, %v1435_v7  ;;  %vm546_vm15 = vcmp.eq.s32.totalorder %v439_v60, %v1438_v13 }
  0x46   : > { %vm1051_vm14 = vmpackc.low %vm564_vm5, %vm563_vm4  ;;  %vm465_vm5 = vcmp.eq.s32.totalorder %v411_v62, %v1435_v7 }
  0x47   : > { %1111 = vmatpush3.bf16.msk.msra.mxu1 %vm1051_vm14, %v1327_v22  ;;  %vm581_vm0 = vmor %vm480_vm3, %vm533_vm8  ;;  %vm464_vm14 = vcmp.eq.s32.totalorder %v410_v61, %v1435_v7  ;;  %vm517_vm3 = vcmp.eq.s32.totalorder %v410_v61, %v1438_v13 }
  0x48   : > { %vm582_vm6 = vmor %vm481_vm13, %vm534_vm12  ;;  %vm518_vm13 = vcmp.eq.s32.totalorder %v411_v62, %v1438_v13 }
  0x49   : > { %vm1069_vm1 = vmpackc.low %vm582_vm6, %vm581_vm0 }
  0x4a   : > { %1112 = vmatprep.subr.msk.bf16.mxu1 %vm1069_vm1, %v1327_v22  ;;  %vm1656_vm4 = vmor %vm492_vm2, %vm545_vm7  ;;  %vm482_vm2 = vcmp.eq.s32.totalorder %v428_v63, %v1435_v7  ;;  %vm535_vm7 = vcmp.eq.s32.totalorder %v428_v63, %v1438_v13 }
  0x4b   : > { %vm594_vm8 = vmor %vm493_vm11, %vm546_vm15  ;;  %vm483_vm11 = vcmp.eq.s32.totalorder %v429_v1, %v1435_v7  ;;  %vm536_vm15 = vcmp.eq.s32.totalorder %v429_v1, %v1438_v13 }
  0x4c   : > { %vm1081_vm12 = vmpackc.low %vm594_vm8, %vm1656_vm4 }
  0x4d   : > { %1156 = vmatprep.subr.msk.bf16.mxu0 %vm1081_vm12, %v1327_v22  ;;  %vm565_vm0 = vmor %vm464_vm14, %vm517_vm3  ;;  %vm494_vm14 = vcmp.eq.s32.totalorder %v440_v3, %v1435_v7  ;;  %vm547_vm3 = vcmp.eq.s32.totalorder %v440_v3, %v1438_v13 }
  0x4e   : > { %vm566_vm6 = vmor %vm465_vm5, %vm518_vm13  ;;  %1157 = vmatpush3.bf16.msk.msra.mxu0 %vm1081_vm12, %v1327_v22  ;;  %vm495_vm5 = vcmp.eq.s32.totalorder %v441_v4, %v1435_v7  ;;  %vm548_vm13 = vcmp.eq.s32.totalorder %v441_v4, %v1438_v13 }
  0x4f   : > { %vm1053_vm1 = vmpackc.low %vm566_vm6, %vm565_vm0 }
  0x50   : > { %1113 = vmatpush3.bf16.msk.msra.mxu1 %vm1053_vm1, %v1327_v22  ;;  %vm583_vm4 = vmor %vm482_vm2, %vm535_vm7  ;;  %vm466_vm2 = vcmp.eq.s32.totalorder %v412_v5, %v1435_v7  ;;  %vm519_vm7 = vcmp.eq.s32.totalorder %v412_v5, %v1438_v13 }
  0x51   : > { %vm584_vm8 = vmor %vm483_vm11, %vm536_vm15  ;;  %vm467_vm11 = vcmp.eq.s32.totalorder %v413_v6, %v1435_v7  ;;  %vm520_vm15 = vcmp.eq.s32.totalorder %v413_v6, %v1438_v13 }
  0x52   : > { %vm1071_vm12 = vmpackc.low %vm584_vm8, %vm583_vm4 }
  0x53   : > { %1114 = vmatprep.subr.msk.bf16.mxu1 %vm1071_vm12, %v1327_v22  ;;  %vm1684_vm0 = vmor %vm494_vm14, %vm547_vm3  ;;  %vm484_vm14 = vcmp.eq.s32.totalorder %v430_v8, %v1435_v7  ;;  %vm537_vm3 = vcmp.eq.s32.totalorder %v430_v8, %v1438_v13 }
  0x54   : > { %vm596_vm6 = vmor %vm495_vm5, %vm548_vm13  ;;  %vm485_vm5 = vcmp.eq.s32.totalorder %v431_v10, %v1435_v7  ;;  %vm538_vm13 = vcmp.eq.s32.totalorder %v431_v10, %v1438_v13 }
  0x55   : > { %vm1083_vm1 = vmpackc.low %vm596_vm6, %vm1684_vm0  ;;  %vm496_vm6 = vcmp.eq.s32.totalorder %v442_v11, %v1435_v7 }
  0x56   : > { %1158 = vmatprep.subr.msk.bf16.mxu0 %vm1083_vm1, %v1327_v22  ;;  %vm567_vm4 = vmor %vm466_vm2, %vm519_vm7  ;;  %vm549_vm2 = vcmp.eq.s32.totalorder %v442_v11, %v1438_v13 }
  0x57   : > { %vm568_vm8 = vmor %vm467_vm11, %vm520_vm15  ;;  %1159 = vmatpush3.bf16.msk.msra.mxu0 %vm1083_vm1, %v1327_v22  ;;  %vm468_vm1 = vcmp.eq.s32.totalorder %v1553_v45, %v1435_v7 }
  0x58   : > { %vm1055_vm12 = vmpackc.low %vm568_vm8, %vm567_vm4  ;;  %vm1854_vm8 = vcmp.eq.s32.totalorder %v1553_v45, %v1438_v13 }
  0x59   : > { %1115 = vmatpush3.bf16.msk.msra.mxu1 %vm1055_vm12, %v1327_v22  ;;  %vm585_vm0 = vmor %vm484_vm14, %vm537_vm3  ;;  %vm469_vm14 = vcmp.eq.s32.totalorder %v1556_v46, %v1435_v7 }
  0x5a   : > { %vm586_vm7 = vmor %vm485_vm5, %vm538_vm13  ;;  %vm1855_vm13 = vcmp.eq.s32.totalorder %v1556_v46, %v1438_v13 }
  0x5b   : > { %vm1073_vm11 = vmpackc.low %vm586_vm7, %vm585_vm0  ;;  %vm1859_vm7 = vcmp.eq.s32.totalorder %v1568_v49, %v1435_v7 }
  0x5c   : > { %1116 = vmatprep.subr.msk.bf16.mxu1 %vm1073_vm11, %v1327_v22  ;;  %vm597_vm15 = vmor %vm496_vm6, %vm549_vm2  ;;  %vm1858_vm2 = vcmp.eq.s32.totalorder %v1568_v49, %v1438_v13 }
  0x5d   : > { %vm598_vm4 = vmor %vm497_vm10, %vm550_vm9  ;;  %vm1856_vm9 = vcmp.eq.s32.totalorder %v1559_v47, %v1438_v13  ;;  %vm1857_vm10 = vcmp.eq.s32.totalorder %v1559_v47, %v1435_v7 }
  0x5e   : > { %vm1085_vm3 = vmpackc.low %vm598_vm4, %vm597_vm15  ;;  %vm1861_vm4 = vcmp.eq.s32.totalorder %v1571_v50, %v1435_v7 }
  0x5f   : > { %1160 = vmatprep.subr.msk.bf16.mxu0 %vm1085_vm3, %v1327_v22  ;;  %vm569_vm5 = vmor %vm468_vm1, %vm1854_vm8  ;;  %vm1860_vm1 = vcmp.eq.s32.totalorder %v1571_v50, %v1438_v13  ;;  %vm1863_vm8 = vcmp.eq.s32.totalorder %v1603_v53, %v1435_v7 }
  0x60   : > { %vm570_vm12 = vmor %vm469_vm14, %vm1855_vm13  ;;  %1161 = vmatpush3.bf16.msk.msra.mxu0 %vm1085_vm3, %v1327_v22  ;;  %vm1862_vm3 = vcmp.eq.s32.totalorder %v1603_v53, %v1438_v13 }
  0x61   : > { %vm1057_vm0 = vmpackc.low %vm570_vm12, %vm569_vm5 }
  0x62   : > { %1117 = vmatpush3.bf16.msk.msra.mxu1 %vm1057_vm0, %v1327_v22  ;;  %vm599_vm6 = vmor %vm1857_vm10, %vm1856_vm9 }
  0x63   : > { %vm600_vm11 = vmor %vm1859_vm7, %vm1858_vm2 }
  0x64   : > { %vm1087_vm15 = vmpackc.low %vm600_vm11, %vm599_vm6 }
  0x65   : > { %796 = vmatmul.mubr.bf16.vlgmr.msra.gmra.mrb[0].mxu1 %v1238_v2  ;;  %1162 = vmatprep.subr.msk.bf16.mxu0 %vm1087_vm15, %v1327_v22  ;;  %vm601_vm14 = vmor %vm1861_vm4, %vm1860_vm1 }
  0x66   : > { %1163 = vmatpush3.bf16.msk.msra.mxu0 %vm1087_vm15, %v1327_v22  ;;  %vm602_vm5 = vmor %vm1863_vm8, %vm1862_vm3  ;;  %803 = vmatprep.mubr.bf16.mxu1 %v1241_v14 }
  0x67   : > { %vm1089_vm13 = vmpackc.low %vm602_vm5, %vm601_vm14 }
  0x68   : > { %1164 = vmatprep.subr.msk.bf16.mxu0 %vm1089_vm13, %v1327_v22 }
  0x6a   : > { %1165 = vmatpush3.bf16.msk.msra.mxu0 %vm1089_vm13, %v1327_v22 }
  0x6d   : > { %804 = vmatmul.mubr.bf16.gmra.mrb[4].mxu1 %v1244_v15  ;;  %1167 = vmatmul.mubr.bf16.vlgmr.msra.gmra.mrb[4].mxu0 %v1245_v16 }
  0x90   : > { %v303_v13 = vpop.permute.xlu1 %302  ;;  %v293_v7 = vpop.permute.xlu0 %292 }
  0x94   : > { %v308_v18 = vpop.permute.xlu1 %307  ;;  %v298_v21 = vpop.permute.xlu0 %297 }
  0xfb   : > { %v1148_v17 = vpop.f32.mrb[0].mxu0 }
  0xfc   : > { %v389_v19 = vadd.f32 %v1148_v17, %v303_v13  ;;  %v380_v20 = vpop.f32.mrb[1].mxu0 }
  0xfd   : > { %v381_v23 = vadd.f32 %v380_v20, %v293_v7  ;;  %v1149_v24 = vpop.f32.mrb[2].mxu0 }
  0xfe   : > { %397 = vst [vmem:[%s1765_s12 + $0x10] sm:$0xff] %v389_v19  ;;  %v392_v22 = vadd.f32 %v1149_v24, %v308_v18  ;;  %v383_v25 = vpop.f32.mrb[3].mxu0 }
  0xff   : > { %395 = vst [vmem:[%s1765_s12] sm:$0xff] %v381_v23  ;;  %v384_v26 = vadd.f32 %v383_v25, %v298_v21 }
 0x100   : > { %398 = vst [vmem:[%s1765_s12 + $0x18] sm:$0xff] %v392_v22 }
 0x101   : > { %396 = vst [vmem:[%s1765_s12 + $0x8] sm:$0xff] %v384_v26 }
 0x138   : > { %v1118_v27 = vpop.f32.mrb[0].mxu1 }
 0x139   : > { %v1119_v28 = vpop.f32.mrb[1].mxu1 }
 0x13a   : > { %v1120_v29 = vadd.f32 %v1119_v28, %v1118_v27  ;;  %v1121_v30 = vpop.f32.mrb[2].mxu1 }
 0x13b   : > { %v1122_v31 = vpop.f32.mrb[3].mxu1 }
 0x13c   : > { %v1123_v32 = vadd.f32 %v1122_v31, %v1121_v30 }
 0x140   : > { %v1124_v33 = vpop.f32.mrb[4].mxu1  ;;  %v1168_v34 = vpop.f32.mrb[4].mxu0 }
 0x141   : > { %v1125_v35 = vpop.f32.mrb[5].mxu1  ;;  %v846_v36 = vpop.f32.mrb[5].mxu0 }
 0x142   : > { %v1126_v37 = vadd.f32 %v1125_v35, %v1124_v33  ;;  %v847_v38 = vadd.f32 %v1120_v29, %v846_v36  ;;  %v1127_v39 = vpop.f32.mrb[6].mxu1  ;;  %v1169_v40 = vpop.f32.mrb[6].mxu0 }
 0x143   : > { %v1128_v41 = vpop.f32.mrb[7].mxu1  ;;  %v849_v42 = vpop.f32.mrb[7].mxu0 }
 0x144   : > { %v855_v43 = vadd.f32 %v1168_v34, %v1126_v37  ;;  %861 = vst [vmem:[%s1765_s12 + $0x20] sm:$0xff] %v847_v38  ;;  %v1129_v44 = vadd.f32 %v1128_v41, %v1127_v39  ;;  %v850_v45 = vadd.f32 %v1123_v32, %v849_v42 }
 0x146   : > { %863 = vst [vmem:[%s1765_s12 + $0x30] sm:$0xff] %v855_v43  ;;  %v858_v46 = vadd.f32 %v1169_v40, %v1129_v44  ;;  %862 = vst [vmem:[%s1765_s12 + $0x28] sm:$0xff] %v850_v45 }
 0x148   : > { %864 = vst [vmem:[%s1765_s12 + $0x38] sm:$0xff] %v858_v46 }
 0x149   : > { %1259 = shalt.err (!%p1256_p5)
}
 0x14a   : > { %s1260_s7 = scalar_lea.hbm %s1777_s17, 1024  ;;  %s1264_s10 = scalar_lea.hbm %s1837_s5, 2048 }
 0x14b   : > { %p1261_p6 = scmp.ne.s32.totalorder %s1777_s17, %s1260_s7  ;;  %p1265_p10 = scmp.lt.u32.totalorder %s1777_s17, %s1837_s5 }
 0x14c   : > { %p1266_p11 = scmp.lt.u32.totalorder %s1264_s10, %s1260_s7  ;;  %p1268_p13 = scmp.lt.u32.totalorder %s1260_s7, %s1777_s17 }
 0x14d   : > { %p1262_p7 = pnand %p1261_p6, %p1401_p4 }
 0x14e   : > { %p1267_p12 = por %p1266_p11, %p1265_p10 }
 0x14f   : > { %p1263_p9 = pneg %p1262_p7 }
 0x150   : > { %p1269_p0 = por %p1268_p13, %p1267_p12 }
 0x152   : > { %p1270_p1 = pnand %p1269_p0, %p1263_p9 }
 0x154   : > { %1273 = shalt.err (!%p1270_p1)
}
 0x155   : > { %s1329_s13 = smov 128   ;;  %s1330_s15 = smov 8  }
 0x156   : > { %1172 = dma.vmem_to_hbm [thread:$0]  (%p1401_p4), %s1779_s14, 1024, %s1777_s17, %s1786_s21, %s1329_s13, %s1329_s13, %s1330_s15  }
 0x157 PF: > { %p1178_p2 = scmp.ge.s32.totalorder %s1324_s23, 2  ;;  %s895_s16 = sand.u32 1, %s1304_s18  }
 0x158   : > { %s896_s24 = scalar_lea.sflag [#allocation3], %s895_s16 }
 0x159   : > { %p1175_p3 = pnand %p1178_p2, %p1408_p8 }
 0x15b   : > { %1299 = dma.done.wait (!%p1175_p3), %s896_s24, 1024  }
 0x15c   : > { %1301 = vsyncadd (!%p1175_p3), %s896_s24, 4294966272  ;;  %s18_s23 = sadd.s32 1, %s1324_s23   ;;  %s1864_s18 = smov %s1308_s19 }
 0x15d   : > { %p15_p5 = scmp.ge.s32.totalorder %s18_s23, 4   ;;  %s1865_s19 = smov %s1312_s20 }
 0x15e   : > { %s1866_s20 = smov %s1414_s6  ;;  %s1867_s21 = smov %s1320_s22 }
 0x15f   : > { %s1868_s22 = smov %s1870_s26  ;;  %17 = sbr.rel (!%p15_p5) target bundleno = 4 (0x4), region = 78 }
 0x166   :  { %901 = vsyncpa [#allocation3], 1 }
 0x167   :  { %903 = vsyncpa [#allocation3 + $0x1], 1 }

</bundles_post_ra>
